<compile_context>
chip_gen: v7x
topology: tpu7x:2x2x1
jax: 0.10.0
libtpu: 0.0.40
codegen_flags: <defaults>
</compile_context>

<pallas_src>
import math

import jax
import jax.numpy as jnp
import numpy as np
from jax.experimental import pallas as pl
from jax.experimental.pallas import tpu as pltpu


def _round_up(x, m):
    return (x + m - 1) // m * m


def _make_fused_convnet_kernel(layer_meta):
    """Build the fused (all-layers) kernel body for a static layer config."""
    n_layers = len(layer_meta)

    def kernel(*refs):
        # refs = (x, w_0, b_0, ..., w_{L-1}, b_{L-1}, out, xs_scratch, h_0, ..., h_{L-2})
        x_ref = refs[0]
        wb_refs = refs[1:1 + 2 * n_layers]
        o_ref = refs[1 + 2 * n_layers]
        xs_ref = refs[2 + 2 * n_layers]          # shared im2col scratch
        h_refs = refs[3 + 2 * n_layers:]         # intermediate activations (VMEM only)

        a_ref = x_ref                            # current layer's input activation
        for li, m in enumerate(layer_meta):
            w_ref = wb_refs[2 * li]              # (cout_pad, K*cin_pad) bf16
            b_ref = wb_refs[2 * li + 1]          # (cout_pad, 1) f32
            cp = m["cin_pad"]
            l_out = m["l_out"]

            # In-kernel im2col: each conv tap is a static lane-offset slice of
            # the flat-frame activation; pack taps along the contraction axis
            # (sublane-aligned: cp is a multiple of 8).
            for k, s in enumerate(m["shifts"]):
                xs_ref[k * cp:(k + 1) * cp, :l_out] = a_ref[:, s:s + l_out]

            kcin = len(m["shifts"]) * cp
            # Single fused MXU matmul per layer, bf16 operands, f32 accumulate.
            acc = jnp.dot(w_ref[...],
                          xs_ref[:kcin, :l_out].astype(jnp.bfloat16),
                          preferred_element_type=jnp.float32)
            act = jnp.maximum(acc + b_ref[...], 0.0)      # fused bias + ReLU

            if li + 1 < n_layers:
                h_refs[li][...] = act            # stays in VMEM, never hits HBM
                a_ref = h_refs[li]
            else:
                o_ref[...] = act.astype(o_ref.dtype)      # lane-dense (C, pixels)

    return kernel


def convnet2d_forward(x, params):
    """ConvNet2d forward (Conv2d(stride=1, dilation=1, valid) -> ReLU per layer),
    all layers fused into one Pallas TPU kernel.

    x: (N, Cin, H, W) f32; params: list of (w (Cout, Cin, KH, KW), b (Cout,)).
    Returns (N, Cout_last, H_out, W_out) in x.dtype.
    """
    N, c_in, H, W = x.shape
    n_layers = len(params)
    assert n_layers >= 1

    # ---- static per-layer metadata ---------------------------------------
    # Activations live in the flat frame of the ORIGINAL image: flat index
    # q = n*H*W + i*W + j. A conv tap (kh, kw) is then the shift q + kh*W + kw
    # for EVERY layer; invalid (row/image-crossing) positions compute finite
    # garbage that no valid output ever reads and that is stripped at the end.
    layer_meta = []
    l_in = N * H * W
    cin, h_cur, w_cur = c_in, H, W
    for (w_, b_) in params:
        cout, cin_w, kh, kw = w_.shape
        assert cin_w == cin, "channel mismatch between consecutive layers"
        assert kh <= h_cur and kw <= w_cur, "kernel larger than feature map"
        shifts = tuple(r * W + c for r in range(kh) for c in range(kw))
        l_out = l_in - ((kh - 1) * W + (kw - 1))
        h_cur, w_cur = h_cur - (kh - 1), w_cur - (kw - 1)
        layer_meta.append(dict(
            cin=cin, cin_pad=_round_up(cin, 8),
            cout=cout, cout_pad=_round_up(cout, 8),
            k=kh * kw, shifts=shifts, l_in=l_in, l_out=l_out,
            h_out=h_cur, w_out=w_cur))
        l_in, cin = l_out, cout

    last = layer_meta[-1]

    # ---- tiny wrapper-side operand prep (no 9x im2col expansion) ----------
    # input: (N, Cin, H, W) -> channel-padded flat frame (Cin_pad, N*H*W) f32
    cp0 = layer_meta[0]["cin_pad"]
    x_flat = jnp.transpose(x, (1, 0, 2, 3)).reshape(c_in, N * H * W)
    x_flat = jnp.pad(x_flat.astype(jnp.float32), ((0, cp0 - c_in), (0, 0)))

    ops = [x_flat]
    for (w_, b_), m in zip(params, layer_meta):
        cout, cin_, kh, kw = w_.shape
        # (Cout, Cin, KH, KW) -> (Cout_pad, K*Cin_pad); contraction ordered
        # (k, ci) to match the xs scratch rows built in-kernel; bf16 operand.
        wt = jnp.transpose(w_, (0, 2, 3, 1)).reshape(cout, kh * kw, cin_)
        wt = jnp.pad(wt, ((0, m["cout_pad"] - cout), (0, 0),
                          (0, m["cin_pad"] - cin_)))
        ops.append(wt.reshape(m["cout_pad"], m["k"] * m["cin_pad"])
                     .astype(jnp.bfloat16))
        bt = jnp.pad(b_.astype(jnp.float32), ((0, m["cout_pad"] - cout),))
        ops.append(bt.reshape(m["cout_pad"], 1))

    # ---- scratch: shared im2col buffer + intermediate activations ---------
    scratch_shapes = [pltpu.VMEM(
        (max(m["k"] * m["cin_pad"] for m in layer_meta),
         max(m["l_out"] for m in layer_meta)), jnp.float32)]
    for m in layer_meta[:-1]:
        scratch_shapes.append(pltpu.VMEM((m["cout_pad"], m["l_out"]),
                                         jnp.float32))

    flops = sum(2 * m["cout"] * m["k"] * m["cin"] * N * m["h_out"] * m["w_out"]
                for m in layer_meta)
    bytes_accessed = (x_flat.size * x_flat.dtype.itemsize
                      + sum(int(np.prod(a.shape)) * a.dtype.itemsize
                            for a in ops[1:])
                      + last["cout_pad"] * last["l_out"] * 4)

    # Single pallas_call, no grid: input, weights, all intermediates and the
    # output are VMEM-resident for the whole forward.
    out_flat = pl.pallas_call(
        _make_fused_convnet_kernel(layer_meta),
        out_shape=jax.ShapeDtypeStruct((last["cout_pad"], last["l_out"]),
                                       jnp.float32),
        scratch_shapes=scratch_shapes,
        cost_estimate=pl.CostEstimate(flops=flops, transcendentals=0,
                                      bytes_accessed=bytes_accessed),
    )(*ops)

    # ---- extract valid pixels from the flat frame (tiny, <32 KiB) ---------
    o = out_flat[:last["cout"]]                                  # drop chan pad
    o = jnp.pad(o, ((0, 0), (0, N * H * W - last["l_out"])))     # back to full frame
    o = o.reshape(last["cout"], N, H, W)[:, :, :last["h_out"], :last["w_out"]]
    return jnp.transpose(o, (1, 0, 2, 3)).astype(x.dtype)


def init_convnet2d_params(key, in_channels, hidden_channels, kernel_sizes):
    """Deterministic init mimicking PyTorch Conv2d default (uniform +-1/sqrt(fan_in))."""
    assert len(hidden_channels) == len(kernel_sizes)
    params = []
    cin = in_channels
    for cout, ksz in zip(hidden_channels, kernel_sizes):
        key, wkey, bkey = jax.random.split(key, 3)
        fan_in = cin * ksz * ksz
        bound = 1.0 / math.sqrt(fan_in)
        w = jax.random.uniform(wkey, (cout, cin, ksz, ksz), jnp.float32,
                               minval=-bound, maxval=bound)
        b = jax.random.uniform(bkey, (cout,), jnp.float32,
                               minval=-bound, maxval=bound)
        params.append((w, b))
        cin = cout
    return params


def _reference_forward(x, params):
    """Pure-JAX f32 reference (lax.conv) for correctness checking."""
    for w, b in params:
        y = jax.lax.conv_general_dilated(
            x, w, window_strides=(1, 1), padding="VALID",
            dimension_numbers=("NCHW", "OIHW", "NCHW"))
        x = jnp.maximum(y + b[None, :, None, None], 0.0)
    return x


if __name__ == "__main__":
    # ConvNet2d(in_channels=4, hidden_channels=[8, 16], kernel_sizes=[3, 3])
    in_channels = 4
    hidden_channels = [8, 16]
    kernel_sizes = [3, 3]

    key = jax.random.PRNGKey(0)
    key, xkey = jax.random.split(key)
    x = jax.random.normal(xkey, (2, in_channels, 16, 16), dtype=jnp.float32)

    params = init_convnet2d_params(key, in_channels, hidden_channels, kernel_sizes)

    fwd = jax.jit(convnet2d_forward)
    out = jax.block_until_ready(fwd(x, params))
    ref = jax.block_until_ready(_reference_forward(x, params))

    assert out.shape == ref.shape == (2, 16, 12, 12), out.shape
    # bf16 MXU operands with f32 accumulation (activations kept f32 in VMEM).
    np.testing.assert_allclose(np.asarray(out), np.asarray(ref),
                               rtol=2e-2, atol=2e-2)

    print("KERNEL_OK")
</pallas_src>

<mosaic_0001>
module attributes {stable_mosaic.version = 11 : i64} {
  func.func @kernel(%arg0: memref<8x512xf32, #tpu.memory_space<vmem>>, %arg1: memref<8x72xbf16, #tpu.memory_space<vmem>>, %arg2: memref<8x1xf32, #tpu.memory_space<vmem>>, %arg3: memref<16x72xbf16, #tpu.memory_space<vmem>>, %arg4: memref<16x1xf32, #tpu.memory_space<vmem>>, %arg5: memref<16x444xf32, #tpu.memory_space<vmem>>, %arg6: memref<72x478xf32, #tpu.memory_space<vmem>>, %arg7: memref<8x478xf32, #tpu.memory_space<vmem>>) attributes {dimension_semantics = [], scalar_prefetch = 0 : i64, scratch_operands = 2 : i64, tpu.core_type = #tpu.core_type<tc>} {
    %c0 = arith.constant 0 : index
    %c0_0 = arith.constant 0 : index
    %0 = vector.load %arg0[%c0, %c0_0] : memref<8x512xf32, #tpu.memory_space<vmem>>, vector<8x478xf32>
    %c0_1 = arith.constant 0 : index
    %c0_2 = arith.constant 0 : index
    %1 = vector.load %arg6[%c0_1, %c0_2] : memref<72x478xf32, #tpu.memory_space<vmem>>, vector<8x478xf32>
    tpu.vector_store %arg6[%c0_1, %c0_2], %0 {strides = array<i32>} : memref<72x478xf32, #tpu.memory_space<vmem>>, vector<8x478xf32>,
    %c0_3 = arith.constant 0 : index
    %c1 = arith.constant 1 : index
    %2 = vector.load %arg0[%c0_3, %c1] : memref<8x512xf32, #tpu.memory_space<vmem>>, vector<8x478xf32>
    %c8 = arith.constant 8 : index
    %c0_4 = arith.constant 0 : index
    %3 = vector.load %arg6[%c8, %c0_4] : memref<72x478xf32, #tpu.memory_space<vmem>>, vector<8x478xf32>
    tpu.vector_store %arg6[%c8, %c0_4], %2 {strides = array<i32>} : memref<72x478xf32, #tpu.memory_space<vmem>>, vector<8x478xf32>,
    %c0_5 = arith.constant 0 : index
    %c2 = arith.constant 2 : index
    %4 = vector.load %arg0[%c0_5, %c2] : memref<8x512xf32, #tpu.memory_space<vmem>>, vector<8x478xf32>
    %c16 = arith.constant 16 : index
    %c0_6 = arith.constant 0 : index
    %5 = vector.load %arg6[%c16, %c0_6] : memref<72x478xf32, #tpu.memory_space<vmem>>, vector<8x478xf32>
    tpu.vector_store %arg6[%c16, %c0_6], %4 {strides = array<i32>} : memref<72x478xf32, #tpu.memory_space<vmem>>, vector<8x478xf32>,
    %c0_7 = arith.constant 0 : index
    %c16_8 = arith.constant 16 : index
    %6 = vector.load %arg0[%c0_7, %c16_8] : memref<8x512xf32, #tpu.memory_space<vmem>>, vector<8x478xf32>
    %c24 = arith.constant 24 : index
    %c0_9 = arith.constant 0 : index
    %7 = vector.load %arg6[%c24, %c0_9] : memref<72x478xf32, #tpu.memory_space<vmem>>, vector<8x478xf32>
    tpu.vector_store %arg6[%c24, %c0_9], %6 {strides = array<i32>} : memref<72x478xf32, #tpu.memory_space<vmem>>, vector<8x478xf32>,
    %c0_10 = arith.constant 0 : index
    %c17 = arith.constant 17 : index
    %8 = vector.load %arg0[%c0_10, %c17] : memref<8x512xf32, #tpu.memory_space<vmem>>, vector<8x478xf32>
    %c32 = arith.constant 32 : index
    %c0_11 = arith.constant 0 : index
    %9 = vector.load %arg6[%c32, %c0_11] : memref<72x478xf32, #tpu.memory_space<vmem>>, vector<8x478xf32>
    tpu.vector_store %arg6[%c32, %c0_11], %8 {strides = array<i32>} : memref<72x478xf32, #tpu.memory_space<vmem>>, vector<8x478xf32>,
    %c0_12 = arith.constant 0 : index
    %c18 = arith.constant 18 : index
    %10 = vector.load %arg0[%c0_12, %c18] : memref<8x512xf32, #tpu.memory_space<vmem>>, vector<8x478xf32>
    %c40 = arith.constant 40 : index
    %c0_13 = arith.constant 0 : index
    %11 = vector.load %arg6[%c40, %c0_13] : memref<72x478xf32, #tpu.memory_space<vmem>>, vector<8x478xf32>
    tpu.vector_store %arg6[%c40, %c0_13], %10 {strides = array<i32>} : memref<72x478xf32, #tpu.memory_space<vmem>>, vector<8x478xf32>,
    %c0_14 = arith.constant 0 : index
    %c32_15 = arith.constant 32 : index
    %12 = vector.load %arg0[%c0_14, %c32_15] : memref<8x512xf32, #tpu.memory_space<vmem>>, vector<8x478xf32>
    %c48 = arith.constant 48 : index
    %c0_16 = arith.constant 0 : index
    %13 = vector.load %arg6[%c48, %c0_16] : memref<72x478xf32, #tpu.memory_space<vmem>>, vector<8x478xf32>
    tpu.vector_store %arg6[%c48, %c0_16], %12 {strides = array<i32>} : memref<72x478xf32, #tpu.memory_space<vmem>>, vector<8x478xf32>,
    %c0_17 = arith.constant 0 : index
    %c33 = arith.constant 33 : index
    %14 = vector.load %arg0[%c0_17, %c33] : memref<8x512xf32, #tpu.memory_space<vmem>>, vector<8x478xf32>
    %c56 = arith.constant 56 : index
    %c0_18 = arith.constant 0 : index
    %15 = vector.load %arg6[%c56, %c0_18] : memref<72x478xf32, #tpu.memory_space<vmem>>, vector<8x478xf32>
    tpu.vector_store %arg6[%c56, %c0_18], %14 {strides = array<i32>} : memref<72x478xf32, #tpu.memory_space<vmem>>, vector<8x478xf32>,
    %c0_19 = arith.constant 0 : index
    %c34 = arith.constant 34 : index
    %16 = vector.load %arg0[%c0_19, %c34] : memref<8x512xf32, #tpu.memory_space<vmem>>, vector<8x478xf32>
    %c64 = arith.constant 64 : index
    %c0_20 = arith.constant 0 : index
    %17 = vector.load %arg6[%c64, %c0_20] : memref<72x478xf32, #tpu.memory_space<vmem>>, vector<8x478xf32>
    tpu.vector_store %arg6[%c64, %c0_20], %16 {strides = array<i32>} : memref<72x478xf32, #tpu.memory_space<vmem>>, vector<8x478xf32>,
    %c0_21 = arith.constant 0 : index
    %c0_22 = arith.constant 0 : index
    %18 = vector.load %arg1[%c0_21, %c0_22] : memref<8x72xbf16, #tpu.memory_space<vmem>>, vector<8x72xbf16>
    %c0_23 = arith.constant 0 : index
    %c0_24 = arith.constant 0 : index
    %19 = vector.load %arg6[%c0_23, %c0_24] : memref<72x478xf32, #tpu.memory_space<vmem>>, vector<72x478xf32>
    %20 = arith.truncf %19 : vector<72x478xf32> to vector<72x478xbf16>
    %cst = arith.constant dense<0.000000e+00> : vector<8x478xf32>
    %21 = tpu.matmul %18, %20, %cst {dimension_numbers = #tpu.dot_dimension_numbers<[1], [0], [0], [1], [0, 0, 1, 1], [], []>} : vector<8x72xbf16>, vector<72x478xbf16>, vector<8x478xf32> -> vector<8x478xf32>
    %c0_25 = arith.constant 0 : index
    %c0_26 = arith.constant 0 : index
    %22 = vector.load %arg2[%c0_25, %c0_26] : memref<8x1xf32, #tpu.memory_space<vmem>>, vector<8x1xf32>
    %23 = vector.broadcast %22 : vector<8x1xf32> to vector<8x478xf32>
    %24 = arith.addf %21, %23 : vector<8x478xf32>
    %cst_27 = arith.constant 0.000000e+00 : f32
    %25 = vector.broadcast %cst_27 : f32 to vector<8x478xf32>
    %26 = arith.maximumf %24, %25 : vector<8x478xf32>
    %c0_28 = arith.constant 0 : index
    %c0_29 = arith.constant 0 : index
    %27 = vector.load %arg7[%c0_28, %c0_29] : memref<8x478xf32, #tpu.memory_space<vmem>>, vector<8x478xf32>
    tpu.vector_store %arg7[%c0_28, %c0_29], %26 {strides = array<i32>} : memref<8x478xf32, #tpu.memory_space<vmem>>, vector<8x478xf32>,
    %c0_30 = arith.constant 0 : index
    %c0_31 = arith.constant 0 : index
    %28 = vector.load %arg7[%c0_30, %c0_31] : memref<8x478xf32, #tpu.memory_space<vmem>>, vector<8x444xf32>
    %c0_32 = arith.constant 0 : index
    %c0_33 = arith.constant 0 : index
    %29 = vector.load %arg6[%c0_32, %c0_33] : memref<72x478xf32, #tpu.memory_space<vmem>>, vector<8x444xf32>
    tpu.vector_store %arg6[%c0_32, %c0_33], %28 {strides = array<i32>} : memref<72x478xf32, #tpu.memory_space<vmem>>, vector<8x444xf32>,
    %c0_34 = arith.constant 0 : index
    %c1_35 = arith.constant 1 : index
    %30 = vector.load %arg7[%c0_34, %c1_35] : memref<8x478xf32, #tpu.memory_space<vmem>>, vector<8x444xf32>
    %c8_36 = arith.constant 8 : index
    %c0_37 = arith.constant 0 : index
    %31 = vector.load %arg6[%c8_36, %c0_37] : memref<72x478xf32, #tpu.memory_space<vmem>>, vector<8x444xf32>
    tpu.vector_store %arg6[%c8_36, %c0_37], %30 {strides = array<i32>} : memref<72x478xf32, #tpu.memory_space<vmem>>, vector<8x444xf32>,
    %c0_38 = arith.constant 0 : index
    %c2_39 = arith.constant 2 : index
    %32 = vector.load %arg7[%c0_38, %c2_39] : memref<8x478xf32, #tpu.memory_space<vmem>>, vector<8x444xf32>
    %c16_40 = arith.constant 16 : index
    %c0_41 = arith.constant 0 : index
    %33 = vector.load %arg6[%c16_40, %c0_41] : memref<72x478xf32, #tpu.memory_space<vmem>>, vector<8x444xf32>
    tpu.vector_store %arg6[%c16_40, %c0_41], %32 {strides = array<i32>} : memref<72x478xf32, #tpu.memory_space<vmem>>, vector<8x444xf32>,
    %c0_42 = arith.constant 0 : index
    %c16_43 = arith.constant 16 : index
    %34 = vector.load %arg7[%c0_42, %c16_43] : memref<8x478xf32, #tpu.memory_space<vmem>>, vector<8x444xf32>
    %c24_44 = arith.constant 24 : index
    %c0_45 = arith.constant 0 : index
    %35 = vector.load %arg6[%c24_44, %c0_45] : memref<72x478xf32, #tpu.memory_space<vmem>>, vector<8x444xf32>
    tpu.vector_store %arg6[%c24_44, %c0_45], %34 {strides = array<i32>} : memref<72x478xf32, #tpu.memory_space<vmem>>, vector<8x444xf32>,
    %c0_46 = arith.constant 0 : index
    %c17_47 = arith.constant 17 : index
    %36 = vector.load %arg7[%c0_46, %c17_47] : memref<8x478xf32, #tpu.memory_space<vmem>>, vector<8x444xf32>
    %c32_48 = arith.constant 32 : index
    %c0_49 = arith.constant 0 : index
    %37 = vector.load %arg6[%c32_48, %c0_49] : memref<72x478xf32, #tpu.memory_space<vmem>>, vector<8x444xf32>
    tpu.vector_store %arg6[%c32_48, %c0_49], %36 {strides = array<i32>} : memref<72x478xf32, #tpu.memory_space<vmem>>, vector<8x444xf32>,
    %c0_50 = arith.constant 0 : index
    %c18_51 = arith.constant 18 : index
    %38 = vector.load %arg7[%c0_50, %c18_51] : memref<8x478xf32, #tpu.memory_space<vmem>>, vector<8x444xf32>
    %c40_52 = arith.constant 40 : index
    %c0_53 = arith.constant 0 : index
    %39 = vector.load %arg6[%c40_52, %c0_53] : memref<72x478xf32, #tpu.memory_space<vmem>>, vector<8x444xf32>
    tpu.vector_store %arg6[%c40_52, %c0_53], %38 {strides = array<i32>} : memref<72x478xf32, #tpu.memory_space<vmem>>, vector<8x444xf32>,
    %c0_54 = arith.constant 0 : index
    %c32_55 = arith.constant 32 : index
    %40 = vector.load %arg7[%c0_54, %c32_55] : memref<8x478xf32, #tpu.memory_space<vmem>>, vector<8x444xf32>
    %c48_56 = arith.constant 48 : index
    %c0_57 = arith.constant 0 : index
    %41 = vector.load %arg6[%c48_56, %c0_57] : memref<72x478xf32, #tpu.memory_space<vmem>>, vector<8x444xf32>
    tpu.vector_store %arg6[%c48_56, %c0_57], %40 {strides = array<i32>} : memref<72x478xf32, #tpu.memory_space<vmem>>, vector<8x444xf32>,
    %c0_58 = arith.constant 0 : index
    %c33_59 = arith.constant 33 : index
    %42 = vector.load %arg7[%c0_58, %c33_59] : memref<8x478xf32, #tpu.memory_space<vmem>>, vector<8x444xf32>
    %c56_60 = arith.constant 56 : index
    %c0_61 = arith.constant 0 : index
    %43 = vector.load %arg6[%c56_60, %c0_61] : memref<72x478xf32, #tpu.memory_space<vmem>>, vector<8x444xf32>
    tpu.vector_store %arg6[%c56_60, %c0_61], %42 {strides = array<i32>} : memref<72x478xf32, #tpu.memory_space<vmem>>, vector<8x444xf32>,
    %c0_62 = arith.constant 0 : index
    %c34_63 = arith.constant 34 : index
    %44 = vector.load %arg7[%c0_62, %c34_63] : memref<8x478xf32, #tpu.memory_space<vmem>>, vector<8x444xf32>
    %c64_64 = arith.constant 64 : index
    %c0_65 = arith.constant 0 : index
    %45 = vector.load %arg6[%c64_64, %c0_65] : memref<72x478xf32, #tpu.memory_space<vmem>>, vector<8x444xf32>
    tpu.vector_store %arg6[%c64_64, %c0_65], %44 {strides = array<i32>} : memref<72x478xf32, #tpu.memory_space<vmem>>, vector<8x444xf32>,
    %c0_66 = arith.constant 0 : index
    %c0_67 = arith.constant 0 : index
    %46 = vector.load %arg3[%c0_66, %c0_67] : memref<16x72xbf16, #tpu.memory_space<vmem>>, vector<16x72xbf16>
    %c0_68 = arith.constant 0 : index
    %c0_69 = arith.constant 0 : index
    %47 = vector.load %arg6[%c0_68, %c0_69] : memref<72x478xf32, #tpu.memory_space<vmem>>, vector<72x444xf32>
    %48 = arith.truncf %47 : vector<72x444xf32> to vector<72x444xbf16>
    %cst_70 = arith.constant dense<0.000000e+00> : vector<16x444xf32>
    %49 = tpu.matmul %46, %48, %cst_70 {dimension_numbers = #tpu.dot_dimension_numbers<[1], [0], [0], [1], [0, 0, 1, 1], [], []>} : vector<16x72xbf16>, vector<72x444xbf16>, vector<16x444xf32> -> vector<16x444xf32>
    %c0_71 = arith.constant 0 : index
    %c0_72 = arith.constant 0 : index
    %50 = vector.load %arg4[%c0_71, %c0_72] : memref<16x1xf32, #tpu.memory_space<vmem>>, vector<16x1xf32>
    %51 = vector.broadcast %50 : vector<16x1xf32> to vector<16x444xf32>
    %52 = arith.addf %49, %51 : vector<16x444xf32>
    %cst_73 = arith.constant 0.000000e+00 : f32
    %53 = vector.broadcast %cst_73 : f32 to vector<16x444xf32>
    %54 = arith.maximumf %52, %53 : vector<16x444xf32>
    %c0_74 = arith.constant 0 : index
    %c0_75 = arith.constant 0 : index
    %55 = vector.load %arg5[%c0_74, %c0_75] : memref<16x444xf32, #tpu.memory_space<vmem>>, vector<16x444xf32>
    tpu.vector_store %arg5[%c0_74, %c0_75], %54 {strides = array<i32>} : memref<16x444xf32, #tpu.memory_space<vmem>>, vector<16x444xf32>,
    return
  }
}

</mosaic_0001>

<bundles_post_ra>
// kernel: convnet2d_forward.1
= control target key start
LH: loop header
LB: loop body
LE: loop exit
PB: predicated region body
PF: predicated region fallthrough
CT: control target
= control target key end

     0   :  { %vm28_vm0 = vcmask 769024   ;;  %s865_s22 = smov 127   ;;  %s866_s27 = smov 126   ;;  %v872_v4 = vmov 0   ;;  %vm46_vm1 = vcmask 1039360   ;;  %vm74_vm2 = vcmask 1031168   ;;  %s1185_s0 = inlined_call_operand.vmem [shape: f32[8,512], index: 0, kind: input, shape index: {}]   ;;  %s1186_s2 = inlined_call_operand.vmem [shape: f32[8,1], index: 2, kind: input, shape index: {}]   ;;  %s1187_s1 = inlined_call_operand.vmem [shape: bf16[8,72], index: 1, kind: input, shape index: {}]   ;;  %s1188_s4 = inlined_call_operand.vmem [shape: f32[16,1], index: 4, kind: input, shape index: {}]   ;;  %s1189_s3 = inlined_call_operand.vmem [shape: bf16[16,72], index: 3, kind: input, shape index: {}]   ;;  %s1190_s5 = inlined_call_operand.vmem [shape: f32[16,444], index: 5, kind: output, shape index: {}]  }
   0x1   :  { %v907_v0 = vld [vmem:[%s1185_s0 + $0x8] sm:$0xff]  ;;  %v912_v1 = vld [vmem:[%s1185_s0] sm:$0xff]  ;;  %v33_v2 = vld [vmem:[%s1185_s0 + $0x18] sm:$0xff]  ;;  %s867_s28 = smov 112   ;;  %s869_s29 = smov 110   ;;  %365 = vmatprep.mubr.bf16.mxu0 %v872_v4  ;;  %406 = vmatprep.mubr.bf16.mxu1 %v872_v4  ;;  %vm102_vm3 = vcmask 916480  }
   0x2   :  { %40 = vrot.lane.b32.xlu0 %v907_v0, %s865_s22  ;;  %38 = vrot.lane.b32.xlu1 %v912_v1, %s865_s22  ;;  %v924_v3 = vld [vmem:[%s1185_s0 + $0x10] sm:$0xff]  ;;  %29 = vst.msk [vmem:[#allocation2 + $0x18] sm:$0xff] %vm28_vm0, %v33_v2  ;;  %s868_s0 = smov 111   ;;  %s870_s30 = smov 96   ;;  %v310_v5 = vld [vmem:[%s1186_s2] sm:$0xff]  ;;  %vm130_vm4 = vcmask 908288  }
   0x3   :  { %s871_s6 = smov 95   ;;  %862 = vset.pattern.permute.xlu0 %v872_v4  ;;  %863 = vset.pattern.permute.xlu1 %v872_v4  ;;  %s873_s7 = smov 94   ;;  %vm158_vm5 = vcmask 900096   ;;  %vm186_vm6 = vcmask 785408   ;;  %vm214_vm7 = vcmask 777216   ;;  %vm320_vm8 = vcmask 1043456  }
   0x4   :  { %vm316_vm9 = vcmask 588800   ;;  %vm430_vm10 = vcmask 490496  }
   0x6   :  { %42 = vrot.lane.b32.xlu0 %v924_v3, %s865_s22  ;;  %44 = vrot.lane.b32.xlu1 %v33_v2, %s865_s22 }
   0x9   :  { %v257_v16 = vld [vmem:[#allocation2 + $0x18] sm:$0xff] }
   0xa   :  { %68 = vrot.lane.b32.xlu0 %v907_v0, %s866_s27  ;;  %70 = vrot.lane.b32.xlu1 %v924_v3, %s866_s27 }
   0xe   :  { %96 = vrot.lane.b32.xlu0 %v907_v0, %s867_s28  ;;  %98 = vrot.lane.b32.xlu1 %v924_v3, %s867_s28 }
  0x12   :  { %66 = vrot.lane.b32.xlu0 %v912_v1, %s866_s27  ;;  %94 = vrot.lane.b32.xlu1 %v912_v1, %s867_s28 }
  0x16   :  { %72 = vrot.lane.b32.xlu0 %v33_v2, %s866_s27  ;;  %100 = vrot.lane.b32.xlu1 %v33_v2, %s867_s28 }
  0x1a   :  { %124 = vrot.lane.b32.xlu0 %v907_v0, %s868_s0  ;;  %126 = vrot.lane.b32.xlu1 %v924_v3, %s868_s0 }
  0x1e   :  { %152 = vrot.lane.b32.xlu0 %v907_v0, %s869_s29  ;;  %154 = vrot.lane.b32.xlu1 %v924_v3, %s869_s29 }
  0x22   :  { %122 = vrot.lane.b32.xlu0 %v912_v1, %s868_s0  ;;  %150 = vrot.lane.b32.xlu1 %v912_v1, %s869_s29 }
  0x26   :  { %128 = vrot.lane.b32.xlu0 %v33_v2, %s868_s0  ;;  %156 = vrot.lane.b32.xlu1 %v33_v2, %s869_s29 }
  0x2a   :  { %180 = vrot.lane.b32.xlu0 %v907_v0, %s870_s30  ;;  %182 = vrot.lane.b32.xlu1 %v924_v3, %s870_s30 }
  0x2e   :  { %208 = vrot.lane.b32.xlu0 %v907_v0, %s871_s6  ;;  %210 = vrot.lane.b32.xlu1 %v924_v3, %s871_s6 }
  0x32   :  { %178 = vrot.lane.b32.xlu0 %v912_v1, %s870_s30  ;;  %206 = vrot.lane.b32.xlu1 %v912_v1, %s871_s6 }
  0x36   :  { %184 = vrot.lane.b32.xlu0 %v33_v2, %s870_s30  ;;  %212 = vrot.lane.b32.xlu1 %v33_v2, %s871_s6 }
  0x3a   :  { %234 = vrot.lane.b32.xlu0 %v912_v1, %s873_s7  ;;  %236 = vrot.lane.b32.xlu1 %v907_v0, %s873_s7 }
  0x3e   :  { %238 = vrot.lane.b32.xlu0 %v924_v3, %s873_s7  ;;  %240 = vrot.lane.b32.xlu1 %v33_v2, %s873_s7 }
  0x42   :  { %313 = vperm.xlu0 %862, %v310_v5  }
  0x74   :  { %v41_v6 = vpop.permute.xlu0 %40  ;;  %v39_v7 = vpop.permute.xlu1 %38 }
  0x75   :  { %v47_v8 = vsel %vm46_vm1, %v39_v7, %v41_v6 }
  0x76   :  { %v290_v13 = vpack.c.bf16 %v47_v8, %v912_v1 }
  0x78   :  { %v43_v9 = vpop.permute.xlu0 %42  ;;  %v45_v10 = vpop.permute.xlu1 %44 }
  0x79   :  { %v48_v11 = vsel %vm46_vm1, %v41_v6, %v43_v9  ;;  %57 = vst.msk [vmem:[#allocation2 + $0x38] sm:$0xff] %vm28_vm0, %v45_v10  ;;  %v49_v17 = vsel %vm46_vm1, %v43_v9, %v45_v10 }
  0x7a   :  { %v291_v12 = vpack.c.bf16 %v48_v11, %v907_v0  ;;  %v292_v24 = vpack.c.bf16 %v49_v17, %v924_v3 }
  0x7c   :  { %v69_v14 = vpop.permute.xlu0 %68  ;;  %v71_v15 = vpop.permute.xlu1 %70  ;;  %333 = vmatprep.subr.bf16.mxu0 %v291_v12 }
  0x7d   :  { %334 = vmatpush1.bf16.msra.mxu0 %v290_v13  ;;  %v76_v21 = vsel %vm74_vm2, %v69_v14, %v71_v15 }
  0x80   :  { %v97_v18 = vpop.permute.xlu0 %96  ;;  %v99_v19 = vpop.permute.xlu1 %98  ;;  %v261_v20 = vld [vmem:[#allocation2 + $0x38] sm:$0xff] }
  0x81   :  { %v104_v22 = vsel %vm102_vm3, %v97_v18, %v99_v19  ;;  %v293_v23 = vpack.c.bf16 %v261_v20, %v257_v16 }
  0x82   :  { %v295_v25 = vpack.c.bf16 %v104_v22, %v76_v21 }
  0x83   :  { %374 = vmatprep.subr.bf16.mxu1 %v293_v23 }
  0x84   :  { %v67_v26 = vpop.permute.xlu0 %66  ;;  %v95_v27 = vpop.permute.xlu1 %94  ;;  %375 = vmatpush1.bf16.msra.mxu1 %v292_v24  ;;  %335 = vmatprep.subr.bf16.mxu0 %v295_v25 }
  0x85   :  { %v75_v28 = vsel %vm74_vm2, %v67_v26, %v69_v14  ;;  %v103_v29 = vsel %vm102_vm3, %v95_v27, %v97_v18  ;;  %v253_v26 = vld [vmem:[%s1187_s1] sm:$0xf] }
  0x86   :  { %v294_v30 = vpack.c.bf16 %v103_v29, %v75_v28 }
  0x88   :  { %v73_v31 = vpop.permute.xlu0 %72  ;;  %v101_v32 = vpop.permute.xlu1 %100  ;;  %336 = vmatpush1.bf16.msra.mxu0 %v294_v30 }
  0x89   :  { %85 = vst.msk [vmem:[#allocation2 + $0x58] sm:$0xff] %vm28_vm0, %v73_v31  ;;  %113 = vst.msk [vmem:[#allocation2 + $0x78] sm:$0xff] %vm28_vm0, %v101_v32  ;;  %v77_v35 = vsel %vm74_vm2, %v71_v15, %v73_v31  ;;  %v105_v36 = vsel %vm102_vm3, %v99_v19, %v101_v32 }
  0x8a   :  { %v296_v44 = vpack.c.bf16 %v105_v36, %v77_v35 }
  0x8c   :  { %v125_v33 = vpop.permute.xlu0 %124  ;;  %v127_v34 = vpop.permute.xlu1 %126 }
  0x8d   :  { %v132_v41 = vsel %vm130_vm4, %v125_v33, %v127_v34 }
  0x90   :  { %v153_v37 = vpop.permute.xlu0 %152  ;;  %v155_v38 = vpop.permute.xlu1 %154  ;;  %v265_v39 = vld [vmem:[#allocation2 + $0x58] sm:$0xff] }
  0x91   :  { %v269_v40 = vld [vmem:[#allocation2 + $0x78] sm:$0xff]  ;;  %v160_v42 = vsel %vm158_vm5, %v153_v37, %v155_v38 }
  0x92   :  { %v297_v43 = vpack.c.bf16 %v269_v40, %v265_v39  ;;  %v299_v45 = vpack.c.bf16 %v160_v42, %v132_v41 }
  0x94   :  { %376 = vmatprep.subr.bf16.mxu1 %v297_v43  ;;  %v123_v46 = vpop.permute.xlu0 %122  ;;  %v151_v47 = vpop.permute.xlu1 %150  ;;  %337 = vmatprep.subr.bf16.mxu0 %v299_v45 }
  0x95   :  { %377 = vmatpush1.bf16.msra.mxu1 %v296_v44  ;;  %v131_v48 = vsel %vm130_vm4, %v123_v46, %v125_v33  ;;  %v159_v49 = vsel %vm158_vm5, %v151_v47, %v153_v37 }
  0x96   :  { %v298_v50 = vpack.c.bf16 %v159_v49, %v131_v48  ;;  %v706_v48 = vld [vmem:[%s1188_s4] sm:$0xff]  ;;  %v707_v49 = vld [vmem:[%s1188_s4 + $0x8] sm:$0xff] }
  0x98   :  { %v129_v51 = vpop.permute.xlu0 %128  ;;  %v157_v52 = vpop.permute.xlu1 %156  ;;  %338 = vmatpush1.bf16.msra.mxu0 %v298_v50 }
  0x99   :  { %141 = vst.msk [vmem:[#allocation2 + $0x98] sm:$0xff] %vm28_vm0, %v129_v51  ;;  %169 = vst.msk [vmem:[#allocation2 + $0xb8] sm:$0xff] %vm28_vm0, %v157_v52  ;;  %v133_v55 = vsel %vm130_vm4, %v127_v34, %v129_v51  ;;  %v161_v56 = vsel %vm158_vm5, %v155_v38, %v157_v52 }
  0x9a   :  { %v300_v0 = vpack.c.bf16 %v161_v56, %v133_v55 }
  0x9c   :  { %v181_v53 = vpop.permute.xlu0 %180  ;;  %v183_v54 = vpop.permute.xlu1 %182 }
  0x9d   :  { %v188_v61 = vsel %vm186_vm6, %v181_v53, %v183_v54 }
  0xa0   :  { %v209_v57 = vpop.permute.xlu0 %208  ;;  %v211_v58 = vpop.permute.xlu1 %210  ;;  %v273_v59 = vld [vmem:[#allocation2 + $0x98] sm:$0xff] }
  0xa1   :  { %v277_v60 = vld [vmem:[#allocation2 + $0xb8] sm:$0xff]  ;;  %v216_v62 = vsel %vm214_vm7, %v209_v57, %v211_v58 }
  0xa2   :  { %v301_v63 = vpack.c.bf16 %v277_v60, %v273_v59  ;;  %v303_v1 = vpack.c.bf16 %v216_v62, %v188_v61 }
  0xa4   :  { %378 = vmatprep.subr.bf16.mxu1 %v301_v63  ;;  %v179_v2 = vpop.permute.xlu0 %178  ;;  %v207_v3 = vpop.permute.xlu1 %206  ;;  %339 = vmatprep.subr.bf16.mxu0 %v303_v1 }
  0xa5   :  { %379 = vmatpush1.bf16.msra.mxu1 %v300_v0  ;;  %v187_v5 = vsel %vm186_vm6, %v179_v2, %v181_v53  ;;  %v215_v6 = vsel %vm214_vm7, %v207_v3, %v209_v57 }
  0xa6   :  { %v302_v7 = vpack.c.bf16 %v215_v6, %v187_v5 }
  0xa8   :  { %v185_v8 = vpop.permute.xlu0 %184  ;;  %v213_v9 = vpop.permute.xlu1 %212  ;;  %340 = vmatpush1.bf16.msra.mxu0 %v302_v7 }
  0xa9   :  { %197 = vst.msk [vmem:[#allocation2 + $0xd8] sm:$0xff] %vm28_vm0, %v185_v8  ;;  %225 = vst.msk [vmem:[#allocation2 + $0xf8] sm:$0xff] %vm28_vm0, %v213_v9  ;;  %v189_v13 = vsel %vm186_vm6, %v183_v54, %v185_v8  ;;  %v217_v14 = vsel %vm214_vm7, %v211_v58, %v213_v9 }
  0xaa   :  { %v304_v22 = vpack.c.bf16 %v217_v14, %v189_v13 }
  0xac   :  { %v235_v10 = vpop.permute.xlu0 %234  ;;  %v237_v11 = vpop.permute.xlu1 %236 }
  0xad   :  { %v242_v12 = vsel %vm28_vm0, %v235_v10, %v237_v11 }
  0xae   :  { %v306_v19 = vpack.c.bf16 %v242_v12, %v242_v12 }
  0xb0   :  { %v239_v15 = vpop.permute.xlu0 %238  ;;  %v241_v16 = vpop.permute.xlu1 %240  ;;  %v281_v17 = vld [vmem:[#allocation2 + $0xd8] sm:$0xff]  ;;  %v322_v25 = vsel %vm320_vm8, %v306_v19, 0 }
  0xb1   :  { %v285_v18 = vld [vmem:[#allocation2 + $0xf8] sm:$0xff]  ;;  %v243_v20 = vsel %vm28_vm0, %v237_v11, %v239_v15  ;;  %252 = vst.msk [vmem:[#allocation2 + $0x118] sm:$0xff] %vm28_vm0, %v241_v16  ;;  %v244_v24 = vsel %vm28_vm0, %v239_v15, %v241_v16 }
  0xb2   :  { %v305_v21 = vpack.c.bf16 %v285_v18, %v281_v17  ;;  %v307_v23 = vpack.c.bf16 %v243_v20, %v243_v20  ;;  %v308_v27 = vpack.c.bf16 %v244_v24, %v244_v24 }
  0xb4   :  { %380 = vmatprep.subr.bf16.mxu1 %v305_v21  ;;  %844 = vmatprep.subr.msk.bf16.mxu0 %vm320_vm8, %v307_v23  ;;  %v328_v30 = vsel %vm320_vm8, %v308_v27, 0 }
  0xb5   :  { %381 = vmatpush1.bf16.msra.mxu1 %v304_v22  ;;  %342 = vmatpush1.bf16.msra.mxu0 %v322_v25 }
  0xb8   :  { %v289_v28 = vld [vmem:[#allocation2 + $0x118] sm:$0xff]  ;;  %845 = vmatmul.mubr.msk.bf16.vlgmr.msra.gmra.mrb[0].mxu0 %vm316_vm9, %v253_v26 }
  0xb9   :  { %v309_v29 = vpack.c.bf16 %v289_v28, %v289_v28  ;;  %770 = vmatprep.mubr.bf16.mxu0 %v872_v4 }
  0xbb   :  { %846 = vmatprep.subr.msk.bf16.mxu1 %vm320_vm8, %v309_v29 }
  0xbc   :  { %383 = vmatpush1.bf16.msra.mxu1 %v328_v30 }
  0xbf   :  { %847 = vmatmul.mubr.msk.bf16.vlgmr.msra.gmra.mrb[0].mxu1 %vm316_vm9, %v253_v26 }
  0xc0   :  { %813 = vmatprep.mubr.bf16.mxu1 %v872_v4 }
  0xc1   :  { %v314_v31 = vpop.permute.xlu0 %313 }
 0x18b   :  { %v367_v32 = vpop.f32.mrb[0].mxu0 }
 0x18c   :  { %v368_v33 = vadd.f32 %v367_v32, %v314_v31  ;;  %v369_v34 = vpop.f32.mrb[1].mxu0 }
 0x18d   :  { %v370_v35 = vadd.f32 %v369_v34, %v314_v31  ;;  %v371_v36 = vpop.f32.mrb[2].mxu0 }
 0x18e   :  { %v1032_v37 = vmax.f32 %v368_v33, 0.0  ;;  %v372_v38 = vpop.f32.mrb[3].mxu0 }
 0x18f   :  { %v1034_v39 = vmax.f32 %v370_v35, 0.0 }
 0x190   :  { %440 = vrot.lane.b32.xlu0 %v1032_v37, %s865_s22 }
 0x192   :  { %v408_v40 = vpop.f32.mrb[0].mxu1 }
 0x193   :  { %v409_v41 = vadd.f32 %v408_v40, %v314_v31  ;;  %v410_v42 = vpop.f32.mrb[1].mxu1 }
 0x194   :  { %v411_v43 = vadd.f32 %v410_v42, %v314_v31  ;;  %v412_v44 = vpop.f32.mrb[2].mxu1  ;;  %467 = vrot.lane.b32.xlu0 %v1032_v37, %s866_s27 }
 0x195   :  { %v1040_v4 = vmax.f32 %v409_v41, 0.0  ;;  %v413_v45 = vpop.f32.mrb[3].mxu1 }
 0x196   :  { %v418_v46 = vmax.f32 %v411_v43, 0.0 }
 0x197   :  { %444 = vrot.lane.b32.xlu1 %v1040_v4, %s865_s22 }
 0x198   :  { %422 = vst.msk [vmem:[#allocation3 + $0x18] sm:$0xff] %vm28_vm0, %v418_v46  ;;  %494 = vrot.lane.b32.xlu0 %v1032_v37, %s867_s28 }
 0x19b   :  { %471 = vrot.lane.b32.xlu1 %v1040_v4, %s866_s27 }
 0x19c   :  { %521 = vrot.lane.b32.xlu0 %v1032_v37, %s868_s0 }
 0x19f   :  { %v426_v47 = vld [vmem:[#allocation3 + $0x18] sm:$0xff]  ;;  %498 = vrot.lane.b32.xlu1 %v1040_v4, %s867_s28 }
 0x1a0   :  { %548 = vrot.lane.b32.xlu0 %v1032_v37, %s869_s29  ;;  %431 = vst.msk [vmem:[#allocation2 + $0x18] sm:$0xff] %vm430_vm10, %v426_v47 }
 0x1a3   :  { %525 = vrot.lane.b32.xlu1 %v1040_v4, %s868_s0 }
 0x1a4   :  { %575 = vrot.lane.b32.xlu0 %v1032_v37, %s870_s30 }
 0x1a7   :  { %552 = vrot.lane.b32.xlu1 %v1040_v4, %s869_s29  ;;  %v653_v16 = vld [vmem:[#allocation2 + $0x18] sm:$0xff] }
 0x1a8   :  { %602 = vrot.lane.b32.xlu0 %v1032_v37, %s871_s6 }
 0x1ab   :  { %579 = vrot.lane.b32.xlu1 %v1040_v4, %s870_s30 }
 0x1ac   :  { %629 = vrot.lane.b32.xlu0 %v1032_v37, %s873_s7 }
 0x1af   :  { %606 = vrot.lane.b32.xlu1 %v1040_v4, %s871_s6 }
 0x1b0   :  { %469 = vrot.lane.b32.xlu0 %v1034_v39, %s866_s27 }
 0x1b3   :  { %446 = vrot.lane.b32.xlu1 %v426_v47, %s865_s22 }
 0x1b4   :  { %496 = vrot.lane.b32.xlu0 %v1034_v39, %s867_s28 }
 0x1b7   :  { %473 = vrot.lane.b32.xlu1 %v426_v47, %s866_s27 }
 0x1b8   :  { %523 = vrot.lane.b32.xlu0 %v1034_v39, %s868_s0 }
 0x1bb   :  { %500 = vrot.lane.b32.xlu1 %v426_v47, %s867_s28 }
 0x1bc   :  { %550 = vrot.lane.b32.xlu0 %v1034_v39, %s869_s29 }
 0x1bf   :  { %527 = vrot.lane.b32.xlu1 %v426_v47, %s868_s0 }
 0x1c0   :  { %577 = vrot.lane.b32.xlu0 %v1034_v39, %s870_s30 }
 0x1c3   :  { %554 = vrot.lane.b32.xlu1 %v426_v47, %s869_s29 }
 0x1c4   :  { %604 = vrot.lane.b32.xlu0 %v1034_v39, %s871_s6 }
 0x1c7   :  { %442 = vrot.lane.b32.xlu1 %v1034_v39, %s865_s22 }
 0x1c8   :  { %633 = vrot.lane.b32.xlu0 %v1040_v4, %s873_s7 }
 0x1cb   :  { %581 = vrot.lane.b32.xlu1 %v426_v47, %s870_s30 }
 0x1cc   :  { %710 = vperm.xlu0 %862, %v706_v48  }
 0x1cf   :  { %608 = vrot.lane.b32.xlu1 %v426_v47, %s871_s6 }
 0x1d3   :  { %631 = vrot.lane.b32.xlu1 %v1034_v39, %s873_s7 }
 0x1d7   :  { %635 = vrot.lane.b32.xlu1 %v426_v47, %s873_s7 }
 0x1db   :  { %715 = vperm.xlu1 %863, %v707_v49  }
 0x202   :  { %v441_v50 = vpop.permute.xlu0 %440 }
 0x206   :  { %v468_v51 = vpop.permute.xlu0 %467 }
 0x209   :  { %v445_v52 = vpop.permute.xlu1 %444 }
 0x20a   :  { %v495_v53 = vpop.permute.xlu0 %494 }
 0x20d   :  { %v472_v54 = vpop.permute.xlu1 %471 }
 0x20e   :  { %v522_v55 = vpop.permute.xlu0 %521 }
 0x211   :  { %v499_v56 = vpop.permute.xlu1 %498 }
 0x212   :  { %v549_v57 = vpop.permute.xlu0 %548 }
 0x215   :  { %v526_v58 = vpop.permute.xlu1 %525 }
 0x216   :  { %v576_v59 = vpop.permute.xlu0 %575 }
 0x219   :  { %v553_v60 = vpop.permute.xlu1 %552 }
 0x21a   :  { %v603_v61 = vpop.permute.xlu0 %602 }
 0x21d   :  { %v580_v62 = vpop.permute.xlu1 %579 }
 0x21e   :  { %v1102_v63 = vpop.permute.xlu0 %629 }
 0x221   :  { %v1104_v0 = vpop.permute.xlu1 %606 }
 0x222   :  { %v470_v1 = vpop.permute.xlu0 %469 }
 0x223   :  { %v1107_v2 = vsel %vm74_vm2, %v468_v51, %v470_v1  ;;  %v476_v3 = vsel %vm74_vm2, %v470_v1, %v472_v54 }
 0x225   :  { %v447_v5 = vpop.permute.xlu1 %446 }
 0x226   :  { %v450_v6 = vsel %vm46_vm1, %v445_v52, %v447_v5  ;;  %458 = vst.msk [vmem:[#allocation2 + $0x38] sm:$0xff] %vm430_vm10, %v447_v5  ;;  %v497_v7 = vpop.permute.xlu0 %496 }
 0x227   :  { %v502_v8 = vsel %vm102_vm3, %v495_v53, %v497_v7  ;;  %v503_v9 = vsel %vm102_vm3, %v497_v7, %v499_v56  ;;  %v688_v21 = vpack.c.bf16 %v450_v6, %v1040_v4  ;;  %v864_v6 = vld [vmem:[%s1189_s3] sm:$0xff]  }
 0x228   :  { %v691_v47 = vpack.c.bf16 %v503_v9, %v476_v3 }
 0x229   :  { %v474_v10 = vpop.permute.xlu1 %473 }
 0x22a   :  { %v477_v11 = vsel %vm74_vm2, %v472_v54, %v474_v10  ;;  %485 = vst.msk [vmem:[#allocation2 + $0x58] sm:$0xff] %vm430_vm10, %v474_v10  ;;  %v524_v12 = vpop.permute.xlu0 %523 }
 0x22b   :  { %v1117_v13 = vsel %vm130_vm4, %v522_v55, %v524_v12  ;;  %v530_v14 = vsel %vm130_vm4, %v524_v12, %v526_v58 }
 0x22d   :  { %v501_v15 = vpop.permute.xlu1 %500  ;;  %v657_v17 = vld [vmem:[#allocation2 + $0x38] sm:$0xff] }
 0x22e   :  { %v504_v18 = vsel %vm102_vm3, %v499_v56, %v501_v15  ;;  %512 = vst.msk [vmem:[#allocation2 + $0x78] sm:$0xff] %vm430_vm10, %v501_v15  ;;  %v689_v19 = vpack.c.bf16 %v657_v17, %v653_v16  ;;  %v551_v20 = vpop.permute.xlu0 %550 }
 0x22f   :  { %v556_v22 = vsel %vm158_vm5, %v549_v57, %v551_v20  ;;  %v557_v23 = vsel %vm158_vm5, %v551_v20, %v553_v60  ;;  %v692_v35 = vpack.c.bf16 %v504_v18, %v477_v11 }
 0x230   :  { %781 = vmatprep.subr.bf16.mxu1 %v689_v19  ;;  %v694_v53 = vpack.c.bf16 %v556_v22, %v1117_v13 }
 0x231   :  { %v528_v24 = vpop.permute.xlu1 %527  ;;  %782 = vmatpush1.bf16.msra.mxu1 %v688_v21  ;;  %v661_v30 = vld [vmem:[#allocation2 + $0x58] sm:$0xff] }
 0x232   :  { %v531_v25 = vsel %vm130_vm4, %v526_v58, %v528_v24  ;;  %539 = vst.msk [vmem:[#allocation2 + $0x98] sm:$0xff] %vm430_vm10, %v528_v24  ;;  %v578_v26 = vpop.permute.xlu0 %577 }
 0x233   :  { %v583_v27 = vsel %vm186_vm6, %v576_v59, %v578_v26  ;;  %v584_v28 = vsel %vm186_vm6, %v578_v26, %v580_v62 }
 0x235   :  { %v555_v29 = vpop.permute.xlu1 %554  ;;  %v665_v31 = vld [vmem:[#allocation2 + $0x78] sm:$0xff] }
 0x236   :  { %v558_v32 = vsel %vm158_vm5, %v553_v60, %v555_v29  ;;  %566 = vst.msk [vmem:[#allocation2 + $0xb8] sm:$0xff] %vm430_vm10, %v555_v29  ;;  %v693_v33 = vpack.c.bf16 %v665_v31, %v661_v30  ;;  %v605_v34 = vpop.permute.xlu0 %604 }
 0x237   :  { %v610_v36 = vsel %vm214_vm7, %v603_v61, %v605_v34  ;;  %v611_v38 = vsel %vm214_vm7, %v605_v34, %v1104_v0  ;;  %v696_v51 = vpack.c.bf16 %v558_v32, %v531_v25 }
 0x238   :  { %783 = vmatprep.subr.bf16.mxu1 %v693_v33  ;;  %v699_v56 = vpack.c.bf16 %v611_v38, %v584_v28  ;;  %v698_v59 = vpack.c.bf16 %v610_v36, %v583_v27 }
 0x239   :  { %784 = vmatpush1.bf16.msra.mxu1 %v692_v35  ;;  %v443_v40 = vpop.permute.xlu1 %442  ;;  %v669_v45 = vld [vmem:[#allocation2 + $0x98] sm:$0xff] }
 0x23a   :  { %v448_v41 = vsel %vm46_vm1, %v441_v50, %v443_v40  ;;  %v449_v42 = vsel %vm46_vm1, %v443_v40, %v445_v52  ;;  %v690_v50 = vpack.c.bf16 %v502_v8, %v1107_v2  ;;  %v695_v52 = vpack.c.bf16 %v557_v23, %v530_v14  ;;  %v634_v54 = vpop.permute.xlu0 %633 }
 0x23b   :  { %v687_v43 = vpack.c.bf16 %v449_v42, %v1034_v39  ;;  %v686_v44 = vpack.c.bf16 %v448_v41, %v1032_v37 }
 0x23d   :  { %v582_v4 = vpop.permute.xlu1 %581  ;;  %v673_v46 = vld [vmem:[#allocation2 + $0xb8] sm:$0xff]  ;;  %738 = vmatprep.subr.bf16.mxu0 %v687_v43 }
 0x23e   :  { %v585_v48 = vsel %vm186_vm6, %v580_v62, %v582_v4  ;;  %593 = vst.msk [vmem:[#allocation2 + $0xd8] sm:$0xff] %vm430_vm10, %v582_v4  ;;  %v697_v49 = vpack.c.bf16 %v673_v46, %v669_v45  ;;  %739 = vmatpush1.bf16.msra.mxu0 %v686_v44 }
 0x23f   :  { %740 = vmatprep.subr.bf16.mxu0 %v691_v47 }
 0x240   :  { %785 = vmatprep.subr.bf16.mxu1 %v697_v49 }
 0x241   :  { %786 = vmatpush1.bf16.msra.mxu1 %v696_v51  ;;  %v609_v39 = vpop.permute.xlu1 %608 }
 0x242   :  { %v612_v37 = vsel %vm214_vm7, %v1104_v0, %v609_v39  ;;  %620 = vst.msk [vmem:[#allocation2 + $0xf8] sm:$0xff] %vm430_vm10, %v609_v39  ;;  %741 = vmatpush1.bf16.msra.mxu0 %v690_v50 }
 0x243   :  { %742 = vmatprep.subr.bf16.mxu0 %v695_v52  ;;  %v700_v5 = vpack.c.bf16 %v612_v37, %v585_v48 }
 0x245   :  { %v632_v55 = vpop.permute.xlu1 %631  ;;  %v677_v61 = vld [vmem:[#allocation2 + $0xd8] sm:$0xff] }
 0x246   :  { %v637_v57 = vsel %vm28_vm0, %v1102_v63, %v632_v55  ;;  %v638_v58 = vsel %vm28_vm0, %v632_v55, %v634_v54  ;;  %743 = vmatpush1.bf16.msra.mxu0 %v694_v53 }
 0x247   :  { %744 = vmatprep.subr.bf16.mxu0 %v699_v56  ;;  %v703_v0 = vpack.c.bf16 %v638_v58, %v638_v58  ;;  %v702_v1 = vpack.c.bf16 %v637_v57, %v637_v57 }
 0x249   :  { %v636_v60 = vpop.permute.xlu1 %635  ;;  %v681_v62 = vld [vmem:[#allocation2 + $0xf8] sm:$0xff]  ;;  %v727_v63 = vsel %vm320_vm8, %v702_v1, 0 }
 0x24a   :  { %v639_v2 = vsel %vm28_vm0, %v634_v54, %v636_v60  ;;  %647 = vst.msk [vmem:[#allocation2 + $0x118] sm:$0xff] %vm430_vm10, %v636_v60  ;;  %v701_v3 = vpack.c.bf16 %v681_v62, %v677_v61  ;;  %745 = vmatpush1.bf16.msra.mxu0 %v698_v59 }
 0x24b   :  { %849 = vmatprep.subr.msk.bf16.mxu0 %vm320_vm8, %v703_v0  ;;  %v704_v7 = vpack.c.bf16 %v639_v2, %v639_v2  ;;  %v711_v11 = vpop.permute.xlu0 %710 }
 0x24c   :  { %787 = vmatprep.subr.bf16.mxu1 %v701_v3 }
 0x24d   :  { %788 = vmatpush1.bf16.msra.mxu1 %v700_v5  ;;  %v733_v10 = vsel %vm320_vm8, %v704_v7, 0 }
 0x24e   :  { %747 = vmatpush1.bf16.msra.mxu0 %v727_v63 }
 0x251   :  { %v685_v8 = vld [vmem:[#allocation2 + $0x118] sm:$0xff]  ;;  %850 = vmatmul.mubr.msk.bf16.vlgmr.msra.gmra.mrb[4].mxu0 %vm316_vm9, %v864_v6 }
 0x252   :  { %v705_v9 = vpack.c.bf16 %v685_v8, %v685_v8 }
 0x254   :  { %851 = vmatprep.subr.msk.bf16.mxu1 %vm320_vm8, %v705_v9 }
 0x255   :  { %790 = vmatpush1.bf16.msra.mxu1 %v733_v10 }
 0x258   :  { %852 = vmatmul.mubr.msk.bf16.vlgmr.msra.gmra.mrb[4].mxu1 %vm316_vm9, %v864_v6 }
 0x25a   :  { %v716_v13 = vpop.permute.xlu1 %715 }
 0x324   :  { %v772_v12 = vpop.f32.mrb[4].mxu0 }
 0x325   :  { %v773_v14 = vadd.f32 %v772_v12, %v711_v11  ;;  %v774_v15 = vpop.f32.mrb[5].mxu0 }
 0x326   :  { %v775_v16 = vadd.f32 %v774_v15, %v711_v11  ;;  %v776_v17 = vpop.f32.mrb[6].mxu0 }
 0x327   :  { %v824_v18 = vmax.f32 %v773_v14, 0.0  ;;  %v777_v19 = vadd.f32 %v776_v17, %v716_v13  ;;  %v778_v20 = vpop.f32.mrb[7].mxu0 }
 0x328   :  { %v825_v21 = vmax.f32 %v775_v16, 0.0  ;;  %v779_v22 = vadd.f32 %v778_v20, %v716_v13 }
 0x329   :  { %832 = vst [vmem:[%s1190_s5] sm:$0xff] %v824_v18  ;;  %v828_v23 = vmax.f32 %v777_v19, 0.0 }
 0x32a   :  { %833 = vst [vmem:[%s1190_s5 + $0x8] sm:$0xff] %v825_v21  ;;  %v829_v24 = vmax.f32 %v779_v22, 0.0 }
 0x32b   :  { %v815_v25 = vpop.f32.mrb[4].mxu1  ;;  %836 = vst [vmem:[%s1190_s5 + $0x20] sm:$0xff] %v828_v23 }
 0x32c   :  { %v816_v26 = vadd.f32 %v815_v25, %v711_v11  ;;  %v817_v27 = vpop.f32.mrb[5].mxu1  ;;  %837 = vst [vmem:[%s1190_s5 + $0x28] sm:$0xff] %v829_v24 }
 0x32d   :  { %v818_v28 = vadd.f32 %v817_v27, %v711_v11  ;;  %v819_v29 = vpop.f32.mrb[6].mxu1 }
 0x32e   :  { %v826_v30 = vmax.f32 %v816_v26, 0.0  ;;  %v820_v31 = vadd.f32 %v819_v29, %v716_v13  ;;  %v821_v32 = vpop.f32.mrb[7].mxu1 }
 0x32f   :  { %v827_v33 = vmax.f32 %v818_v28, 0.0  ;;  %v822_v34 = vadd.f32 %v821_v32, %v716_v13 }
 0x330   :  { %834 = vst [vmem:[%s1190_s5 + $0x10] sm:$0xff] %v826_v30  ;;  %v830_v35 = vmax.f32 %v820_v31, 0.0 }
 0x331   :  { %835 = vst.msk [vmem:[%s1190_s5 + $0x18] sm:$0xff] %vm430_vm10, %v827_v33  ;;  %v831_v36 = vmax.f32 %v822_v34, 0.0 }
 0x332   :  { %838 = vst [vmem:[%s1190_s5 + $0x30] sm:$0xff] %v830_v35 }
 0x333   :  { %839 = vst.msk [vmem:[%s1190_s5 + $0x38] sm:$0xff] %vm430_vm10, %v831_v36 }

</bundles_post_ra>
